<compile_context>
chip_gen: v7x
topology: tpu7x:2x2x1
jax: 0.10.0
libtpu: 0.0.40
codegen_flags: <defaults>
</compile_context>

<pallas_src>
import jax
import jax.numpy as jnp
from jax.experimental import pallas as pl
from jax.experimental.pallas import tpu as pltpu


def _round_up(x, m):
    return ((x + m - 1) // m) * m


def _tile_caps():
    """Generation-aware tile caps (tm, tn, tk) and a VMEM scoped-limit hint."""
    try:
        vmem = pltpu.get_tpu_info().vmem_capacity_bytes
    except Exception:
        vmem = 64 << 20
    if vmem >= (96 << 20):                 # v5e / v6e: 128 MiB physical VMEM
        return (512, 1024, 1024), 64 << 20
    # v7x: 64 MiB physical VMEM. The (512, 1024, 1024) f32 working set is
    # ~18 MiB double-buffered, comfortably inside a 48 MiB scoped limit.
    return (512, 1024, 1024), 48 << 20


def _make_single_k_kernel(compute_dtype):
    """Grid K extent == 1: fused matmul + bias + store, no accumulator."""
    def kernel(x_ref, wt_ref, b_ref, o_ref):
        lhs = x_ref[...]
        rhs = wt_ref[...]
        if compute_dtype is not None:
            lhs = lhs.astype(compute_dtype)
            rhs = rhs.astype(compute_dtype)
        acc = jnp.dot(lhs, rhs, preferred_element_type=jnp.float32)
        o_ref[...] = (acc + b_ref[...]).astype(o_ref.dtype)
    return kernel


def _make_multi_k_f32out_kernel(compute_dtype):
    """f32 output: accumulate directly into the K-resident output block."""
    def kernel(x_ref, wt_ref, b_ref, o_ref):
        k = pl.program_id(2)

        @pl.when(k == 0)
        def _init():
            o_ref[...] = jnp.zeros_like(o_ref)

        lhs = x_ref[...]
        rhs = wt_ref[...]
        if compute_dtype is not None:
            lhs = lhs.astype(compute_dtype)
            rhs = rhs.astype(compute_dtype)
        o_ref[...] += jnp.dot(lhs, rhs, preferred_element_type=jnp.float32)

        @pl.when(k == pl.num_programs(2) - 1)
        def _bias():
            o_ref[...] += b_ref[...]
    return kernel


def _make_multi_k_kernel(compute_dtype):
    """Narrow output dtype: f32 VMEM accumulator, bias + downcast in epilogue."""
    def kernel(x_ref, wt_ref, b_ref, o_ref, acc_ref):
        k = pl.program_id(2)

        @pl.when(k == 0)
        def _init():
            acc_ref[...] = jnp.zeros_like(acc_ref)

        lhs = x_ref[...]
        rhs = wt_ref[...]
        if compute_dtype is not None:
            lhs = lhs.astype(compute_dtype)
            rhs = rhs.astype(compute_dtype)
        acc_ref[...] += jnp.dot(lhs, rhs, preferred_element_type=jnp.float32)

        @pl.when(k == pl.num_programs(2) - 1)
        def _epilogue():
            o_ref[...] = (acc_ref[...] + b_ref[...]).astype(o_ref.dtype)
    return kernel


def linear_forward(x, weight, bias, tiles=None, compute_dtype=None):
    """nn.Linear forward: x @ weight.T + bias.

    x:       [B, IN]
    weight:  [OUT, IN]  (PyTorch layout)
    bias:    [OUT]
    tiles:   optional (tm_cap, tn_cap, tk_cap) override (testing/tuning).
    compute_dtype: optional MXU input dtype (e.g. jnp.bfloat16) for ~3x MXU
        throughput with f32 accumulation. Changes numerics; off by default.
    returns  [B, OUT] in x.dtype
    """
    B, IN = x.shape
    OUT, IN_w = weight.shape
    assert IN_w == IN

    caps, vmem_limit = _tile_caps()
    if tiles is not None:
        caps = tiles
    tm_cap, tn_cap, tk_cap = caps

    # dtype-aware sublane packing (f32: 8, bf16: 16, int8/fp8: 32)
    sublane = {4: 8, 2: 16, 1: 32}.get(jnp.dtype(x.dtype).itemsize, 8)

    # ---- M (batch): full-dim block when it fits (no pad); else tile + pad ----
    if B <= tm_cap:
        tm, Bp = B, B
    else:
        tm = max(sublane, (tm_cap // sublane) * sublane)
        Bp = _round_up(B, tm)

    # ---- K (input features): full-dim block when it fits (no pad) ----
    if IN <= tk_cap:
        tk, INp = IN, IN
    else:
        tk = tk_cap
        INp = _round_up(IN, tk)

    # ---- N (output features): keep lane-dense (multiple of 128) stores ----
    tn = min(tn_cap, _round_up(OUT, 128))
    OUTp = _round_up(OUT, tn)

    # If the whole problem is a single (i, j) block, split OUT so both v7x
    # TensorCores get work on the "parallel" axes (clean split, no extra pad).
    if Bp // tm == 1 and OUTp // tn == 1 and tn % 256 == 0:
        tn //= 2

    grid = (Bp // tm, OUTp // tn, INp // tk)
    gi, gj, gk = grid

    # ---- operand prep (single fused pass each; skipped when unchanged) ----
    xp = x
    if Bp != B or INp != IN:
        xp = jnp.pad(x, ((0, Bp - B), (0, INp - IN)))

    # Weight → canonical [K, N] MXU orientation, padded once outside the loop.
    wt = weight.T                                        # [IN, OUT]
    if INp != IN or OUTp != OUT:
        wt = jnp.pad(wt, ((0, INp - IN), (0, OUTp - OUT)))

    # Bias carried as f32 so the in-kernel add is already in accumulator dtype.
    bp = bias.reshape(1, OUT).astype(jnp.float32)
    if OUTp != OUT:
        bp = jnp.pad(bp, ((0, 0), (0, OUTp - OUT)))

    itemsize = jnp.dtype(x.dtype).itemsize
    cost = pl.CostEstimate(
        flops=2 * Bp * INp * OUTp,
        transcendentals=0,
        # Account for operand re-reads: X read once per OUT tile, W once per
        # batch tile, bias once per batch tile, output written once.
        bytes_accessed=(Bp * INp * gj + INp * OUTp * gi + OUTp * gi
                        + Bp * OUTp) * itemsize,
    )

    out_dtype = x.dtype
    if gk == 1:
        kernel = _make_single_k_kernel(compute_dtype)
        scratch = []
    elif out_dtype == jnp.float32:
        kernel = _make_multi_k_f32out_kernel(compute_dtype)
        scratch = []
    else:
        kernel = _make_multi_k_kernel(compute_dtype)
        scratch = [pltpu.VMEM((tm, tn), jnp.float32)]

    out_p = pl.pallas_call(
        kernel,
        out_shape=jax.ShapeDtypeStruct((Bp, OUTp), out_dtype),
        grid_spec=pltpu.PrefetchScalarGridSpec(
            num_scalar_prefetch=0,
            grid=grid,
            in_specs=[
                pl.BlockSpec((tm, tk), lambda i, j, k: (i, k)),   # x   [M, K]
                pl.BlockSpec((tk, tn), lambda i, j, k: (k, j)),   # W^T [K, N]
                pl.BlockSpec((1, tn), lambda i, j, k: (0, j)),    # b   [1, N]
            ],
            out_specs=pl.BlockSpec((tm, tn), lambda i, j, k: (i, j)),
            scratch_shapes=scratch,
        ),
        compiler_params=pltpu.CompilerParams(
            dimension_semantics=("parallel", "parallel", "arbitrary"),
            vmem_limit_bytes=vmem_limit,
        ),
        cost_estimate=cost,
    )(xp, wt, bp)

    if Bp != B or OUTp != OUT:
        out_p = out_p[:B, :OUT]
    return out_p


if __name__ == "__main__":
    # Shapes consistent with nn.Linear(input_size, output_size)
    batch, input_size, output_size = 8, 32, 16

    key = jax.random.PRNGKey(0)
    kx, kw, kb = jax.random.split(key, 3)

    x = jax.random.normal(kx, (batch, input_size), dtype=jnp.float32)
    # Deterministic parameter init (PyTorch-style uniform bound 1/sqrt(fan_in))
    bound = 1.0 / jnp.sqrt(jnp.float32(input_size))
    weight = jax.random.uniform(
        kw, (output_size, input_size), dtype=jnp.float32, minval=-bound, maxval=bound
    )
    bias = jax.random.uniform(
        kb, (output_size,), dtype=jnp.float32, minval=-bound, maxval=bound
    )

    out = jax.block_until_ready(linear_forward(x, weight, bias))
    ref = x @ weight.T + bias
    assert out.shape == (batch, output_size)
    assert jnp.allclose(out, ref, atol=1e-5, rtol=1e-5)

    # Multi-tile M/N/K path (grid = (2, 2, 2)) exercising the f32
    # accumulate-in-output kernel, forced via small tile caps.
    B2, IN2, OUT2 = 16, 256, 256
    k2x, k2w, k2b = jax.random.split(jax.random.PRNGKey(1), 3)
    x2 = jax.random.normal(k2x, (B2, IN2), dtype=jnp.float32)
    w2 = jax.random.normal(k2w, (OUT2, IN2), dtype=jnp.float32) * 0.05
    b2 = jax.random.normal(k2b, (OUT2,), dtype=jnp.float32)
    out2 = jax.block_until_ready(linear_forward(x2, w2, b2, tiles=(8, 128, 128)))
    ref2 = x2 @ w2.T + b2
    assert jnp.allclose(out2, ref2, atol=1e-4, rtol=1e-4)

    # bf16 inputs exercise the scratch-accumulator + downcast-epilogue path.
    B3, IN3, OUT3 = 32, 256, 256
    k3x, k3w, k3b = jax.random.split(jax.random.PRNGKey(2), 3)
    x3 = jax.random.normal(k3x, (B3, IN3), dtype=jnp.float32).astype(jnp.bfloat16)
    w3 = (jax.random.normal(k3w, (OUT3, IN3), dtype=jnp.float32) * 0.05).astype(jnp.bfloat16)
    b3 = jax.random.normal(k3b, (OUT3,), dtype=jnp.float32).astype(jnp.bfloat16)
    out3 = jax.block_until_ready(linear_forward(x3, w3, b3, tiles=(16, 128, 128)))
    ref3 = (x3.astype(jnp.float32) @ w3.astype(jnp.float32).T
            + b3.astype(jnp.float32))
    assert out3.dtype == jnp.bfloat16
    assert jnp.allclose(out3.astype(jnp.float32), ref3, atol=2e-2, rtol=2e-2)

    print("KERNEL_OK")
</pallas_src>

<mosaic_0001>
module attributes {stable_mosaic.version = 11 : i64} {
  func.func @kernel(%arg0: i32, %arg1: i32, %arg2: i32, %arg3: memref<8x32xf32, #tpu.memory_space<vmem>>, %arg4: memref<32x128xf32, #tpu.memory_space<vmem>>, %arg5: memref<1x128xf32, #tpu.memory_space<vmem>>, %arg6: memref<8x128xf32, #tpu.memory_space<vmem>>) attributes {dimension_semantics = [#tpu.dimension_semantics<parallel>, #tpu.dimension_semantics<parallel>, #tpu.dimension_semantics<arbitrary>], iteration_bounds = array<i64: 1, 1, 1>, scalar_prefetch = 0 : i64, scratch_operands = 0 : i64, tpu.core_type = #tpu.core_type<tc>, window_params = [{transform_indices = @transform_0, window_bounds = array<i64: 8, 32>}, {transform_indices = @transform_1, window_bounds = array<i64: 32, 128>}, {transform_indices = @transform_2, window_bounds = array<i64: 1, 128>}, {transform_indices = @transform_3, window_bounds = array<i64: 8, 128>}]} {
    %c0 = arith.constant 0 : index
    %c0_0 = arith.constant 0 : index
    %0 = vector.load %arg3[%c0, %c0_0] : memref<8x32xf32, #tpu.memory_space<vmem>>, vector<8x32xf32>
    %c0_1 = arith.constant 0 : index
    %c0_2 = arith.constant 0 : index
    %1 = vector.load %arg4[%c0_1, %c0_2] : memref<32x128xf32, #tpu.memory_space<vmem>>, vector<32x128xf32>
    %cst = arith.constant dense<0.000000e+00> : vector<8x128xf32>
    %2 = tpu.matmul %0, %1, %cst {dimension_numbers = #tpu.dot_dimension_numbers<[1], [0], [0], [1], [0, 0, 1, 1], [], []>} : vector<8x32xf32>, vector<32x128xf32>, vector<8x128xf32> -> vector<8x128xf32>
    %c0_3 = arith.constant 0 : index
    %c0_4 = arith.constant 0 : index
    %3 = vector.load %arg5[%c0_3, %c0_4] : memref<1x128xf32, #tpu.memory_space<vmem>>, vector<1x128xf32>
    %4 = vector.broadcast %3 : vector<1x128xf32> to vector<8x128xf32>
    %5 = arith.addf %2, %4 : vector<8x128xf32>
    %c0_5 = arith.constant 0 : index
    %c0_6 = arith.constant 0 : index
    %6 = vector.load %arg6[%c0_5, %c0_6] : memref<8x128xf32, #tpu.memory_space<vmem>>, vector<8x128xf32>
    tpu.vector_store %arg6[%c0_5, %c0_6], %5 {strides = array<i32>} : memref<8x128xf32, #tpu.memory_space<vmem>>, vector<8x128xf32>,
    return
  }
  func.func @transform_0(%arg0: i32, %arg1: i32, %arg2: i32) -> (i32, i32) {
    %c0_i32 = arith.constant 0 : i32
    return %arg0, %arg2 : i32, i32
  }
  func.func @transform_1(%arg0: i32, %arg1: i32, %arg2: i32) -> (i32, i32) {
    %c0_i32 = arith.constant 0 : i32
    return %arg2, %arg1 : i32, i32
  }
  func.func @transform_2(%arg0: i32, %arg1: i32, %arg2: i32) -> (i32, i32) {
    %c0_i32 = arith.constant 0 : i32
    %c0_i32_0 = arith.constant 0 : i32
    return %c0_i32, %arg1 : i32, i32
  }
  func.func @transform_3(%arg0: i32, %arg1: i32, %arg2: i32) -> (i32, i32) {
    %c0_i32 = arith.constant 0 : i32
    return %arg0, %arg1 : i32, i32
  }
}

</mosaic_0001>

<bundles_post_ra>
// kernel: tpu_custom_call.1
= control target key start
LH: loop header
LB: loop body
LE: loop exit
PB: predicated region body
PF: predicated region fallthrough
CT: control target
= control target key end

     0   :  { %8 = vsyncpa [#allocation3], 0  ;;  %s322_s0 = inlined_call_operand.hbm [shape: f32[8,32], index: 0, kind: input, shape index: {}]   ;;  %s323_s1 = inlined_call_operand.hbm [shape: f32[32,128], index: 1, kind: input, shape index: {}]   ;;  %s324_s2 = inlined_call_operand.vmem [shape: f32[1,128], index: 2, kind: input, shape index: {}]   ;;  %s325_s3 = inlined_call_operand.hbm [shape: f32[8,128], index: 3, kind: output, shape index: {}]  }
   0x1   :  { %9 = vsyncpa [#allocation6], 0 }
   0x2   :  { %10 = vsyncpa [#allocation4], 0  ;;  %s248_s12 = smov [#allocation2]   ;;  %s249_s14 = smov [#allocation5]  }
   0x3   :  { %s17_s13 = sshll.u32 %s248_s12, 4  ;;  %s26_s15 = sshll.u32 %s249_s14, 4  ;;  %s18_s13 = int_to_ptr.vmem [resolvable:$true] %s17_s13  ;;  %s276_s15 = int_to_ptr.vmem [resolvable:$true] %s26_s15 }
   0x4   :  { %s176_s18 = scalar_lea.hbm %s322_s0, 128 }
   0x5   :  { %p177_p0 = scmp.ne.s32.totalorder %s322_s0, %s176_s18  ;;  %p180_p1 = scmp.lt.u32.totalorder %s176_s18, %s322_s0 }
   0x7   :  { %p182_p2 = pnand %p180_p1, %p177_p0 }
   0x9   :  { %185 = shalt.err (!%p182_p2)
}
   0xa   :  { %s186_s23 = scalar_lea.vmem %s18_s13, 128  ;;  %p191_p4 = scmp.lt.s32.totalorder %s18_s13, %s18_s13 }
   0xb   :  { %p187_p3 = scmp.ne.s32.totalorder %s18_s13, %s186_s23  ;;  %p192_p5 = scmp.lt.s32.totalorder %s186_s23, %s186_s23 }
   0xd   :  { %p193_p6 = por %p192_p5, %p191_p4 }
   0xf   :  { %p194_p7 = pnand %p193_p6, %p187_p3 }
  0x11   :  { %197 = shalt.err (!%p194_p7)
}
  0x12   :  { %20 = dma.hbm_to_vmem [thread:$0]  %s322_s0, 128, %s18_s13, [#allocation3]  }
  0x13   :  { %s198_s28 = scalar_lea.hbm %s323_s1, 512 }
  0x14   :  { %p199_p8 = scmp.ne.s32.totalorder %s323_s1, %s198_s28  ;;  %p202_p9 = scmp.lt.u32.totalorder %s198_s28, %s323_s1 }
  0x16   :  { %p204_p10 = pnand %p202_p9, %p199_p8 }
  0x18   :  { %207 = shalt.err (!%p204_p10)
}
  0x19   :  { %s208_s6 = scalar_lea.vmem %s276_s15, 512  ;;  %p213_p12 = scmp.lt.s32.totalorder %s276_s15, %s276_s15 }
  0x1a   :  { %p209_p11 = scmp.ne.s32.totalorder %s276_s15, %s208_s6  ;;  %p214_p13 = scmp.lt.s32.totalorder %s208_s6, %s208_s6 }
  0x1c   :  { %p215_p0 = por %p214_p13, %p213_p12 }
  0x1e   :  { %p216_p1 = pnand %p215_p0, %p209_p11 }
  0x20   :  { %219 = shalt.err (!%p216_p1)
}
  0x21   :  { %s250_s0 = smov 128   ;;  %s251_s7 = smov 8  }
  0x22   :  { %32 = dma.hbm_to_vmem [thread:$0]  %s323_s1, 512, %s276_s15, [#allocation6], %s250_s0, %s250_s0, %s251_s7  }
  0x23   :  { %242 = dma.done.wait [#allocation3], 128  }
  0x24   :  { %243 = vsyncadd [#allocation3], 4294967168 }
  0x25   :  { %244 = dma.done.wait [#allocation6], 512  }
  0x26   :  { %245 = vsyncadd [#allocation6], 4294966784  ;;  %v252_v0 = vmov 0.0|0.0   ;;  %vm253_vm0 = vmmov 0   ;;  %v254_v1 = vmov 0.0   ;;  %v42_v2 = vld [vmem:[#allocation5] sm:$0xff] }
  0x27   :  { %162 = vmatprep.subr.bf16.mxu0 %v252_v0  ;;  %159 = vmatprep.mubr.msk.f32.mxu0 %vm253_vm0, %v254_v1  ;;  %v43_v3 = vld [vmem:[#allocation5 + $0x8] sm:$0xff]  ;;  %v44_v4 = vld [vmem:[#allocation5 + $0x10] sm:$0xff]  ;;  %v45_v6 = vld [vmem:[#allocation5 + $0x18] sm:$0xff]  ;;  %vm53_vm1 = vcmask 261120   ;;  %s255_s11 = smov [#allocation7]  }
  0x28   :  { %v163_v5 = vpack.c.bf16 %v43_v3, %v42_v2  ;;  %v166_v7 = vpack.c.bf16 %v45_v6, %v44_v4  ;;  %v41_v8 = vld [vmem:[#allocation2] sm:$0xff]  ;;  %s134_s12 = sshll.u32 %s255_s11, 4  ;;  %s135_s12 = int_to_ptr.vmem [resolvable:$true] %s134_s12 }
  0x29   :  { %v144_v9 = vld [vmem:[%s324_s2] ss:$0 sm:$0xff]  ;;  %s220_s13 = scalar_lea.vmem %s135_s12, 128  ;;  %p225_p3 = scmp.lt.s32.totalorder %s135_s12, %s135_s12 }
  0x2a   :  { %164 = vmatpush3.bf16.msra.mxu0 %v163_v5  ;;  %p221_p2 = scmp.ne.s32.totalorder %s135_s12, %s220_s13  ;;  %p226_p4 = scmp.lt.s32.totalorder %s220_s13, %s220_s13 }
  0x2b   :  { %165 = vmatprep.subr.bf16.mxu0 %v252_v0 }
  0x2c   :  { %p227_p5 = por %p226_p4, %p225_p3 }
  0x2e   :  { %167 = vmatpush3.bf16.msra.mxu0 %v166_v7  ;;  %p228_p6 = pnand %p227_p5, %p221_p2 }
  0x31   :  { %160 = vmatmul.mubr.msk.f32.vlgmr.msra.gmra.mrb[0].mxu0 %vm53_vm1, %v41_v8 }
 0x104   :  { %v123_v10 = vpop.f32.mrb[0].mxu0 }
 0x105   :  { %v124_v11 = vadd.f32 %v144_v9, %v123_v10  ;;  %v161_v12 = vpop.f32.mrb[1].mxu0 }
 0x107   :  { %127 = vst [vmem:[#allocation7] sm:$0xff] %v124_v11 }
 0x108   :  { %231 = shalt.err (!%p228_p6)
}
 0x109   :  { %s232_s16 = scalar_lea.hbm %s325_s3, 128 }
 0x10a   :  { %p233_p7 = scmp.ne.s32.totalorder %s325_s3, %s232_s16  ;;  %p236_p8 = scmp.lt.u32.totalorder %s232_s16, %s325_s3 }
 0x10c   :  { %p238_p9 = pnand %p236_p8, %p233_p7 }
 0x10e   :  { %241 = shalt.err (!%p238_p9)
}
 0x10f   :  { %137 = dma.vmem_to_hbm [thread:$0]  %s135_s12, 128, %s325_s3, [#allocation4]  }
 0x110   :  { %246 = dma.done.wait [#allocation4], 128  }
 0x111   :  { %247 = vsyncadd [#allocation4], 4294967168 }
 0x112   :  { %141 = vsyncpa [#allocation3], 1 }
 0x113   :  { %142 = vsyncpa [#allocation6], 1 }
 0x114   :  { %143 = vsyncpa [#allocation4], 1 }

</bundles_post_ra>
